<compile_context>
chip_gen: v7x
topology: tpu7x:2x2x1
jax: 0.10.0
libtpu: 0.0.40
codegen_flags: <defaults>
</compile_context>

<pallas_src>
import functools

import jax
import jax.numpy as jnp
from jax.experimental import pallas as pl
from jax.experimental.pallas import tpu as pltpu


def lstm_forward_kernel(embed_ref, w_emb_ref, b_emb_ref,
                        w_ih_ref, w_hh_ref, b_gates_ref,
                        w_dec_ref, b_dec_ref,
                        out_ref, *, hidden_size, length):
    """embed Linear -> unrolled LSTM recurrence -> hoisted decoder Linear."""
    H = hidden_size
    L = length
    B = embed_ref.shape[0]

    # self.embed: e = embed @ W_emb^T + b_emb   (bf16 operands, f32 accumulate)
    e = (jnp.dot(embed_ref[...].astype(jnp.bfloat16), w_emb_ref[...],
                 preferred_element_type=jnp.float32) + b_emb_ref[...])

    # The LSTM sees the same vector at every timestep (unsqueeze + repeat), so
    # the input projection of the gates is loop-invariant: hoist it.
    x_gates = (jnp.dot(e.astype(jnp.bfloat16), w_ih_ref[...],
                       preferred_element_type=jnp.float32) + b_gates_ref[...])

    # Hoist the recurrent weight load out of the unrolled loop ((H, 4H) bf16).
    w_hh = w_hh_ref[...]

    # initHidden: zero h0 / c0, carried in vregs (no VMEM round trips).
    h = jnp.zeros((B, H), jnp.float32)
    c = jnp.zeros((B, H), jnp.float32)
    h_b = h.astype(jnp.bfloat16)        # bf16 copy feeding the MXU

    # Fully unrolled recurrence (L is small and static); per-step critical path
    # is one small bf16 (B,H)@(H,4H) matmul + gate nonlinearities (EUP).
    hs = []
    for t in range(L):
        gates = x_gates + jnp.dot(h_b, w_hh, preferred_element_type=jnp.float32)
        # Gate columns were pre-permuted to [i, f, o, g]:
        #   one contiguous sigmoid region + one tanh region (fewer EUP pushes).
        ifo = jax.nn.sigmoid(gates[:, 0:3 * H])
        g = jnp.tanh(gates[:, 3 * H:4 * H])
        i = ifo[:, 0 * H:1 * H]
        f = ifo[:, 1 * H:2 * H]
        o = ifo[:, 2 * H:3 * H]
        c = f * c + i * g
        h = o * jnp.tanh(c)
        h_b = h.astype(jnp.bfloat16)    # for the next recurrence step
        hs.append(h)                    # history stays in vregs (L*B*H is tiny)

    # Decoder hoisted out of the loop: ONE bf16 matmul + bias and ONE
    # unmasked, lane-dense (L*B, O_pad=128) store.
    h_all = jnp.concatenate(hs, axis=0).astype(jnp.bfloat16)   # rows ordered (t, b)
    out_ref[...] = (jnp.dot(h_all, w_dec_ref[...],
                            preferred_element_type=jnp.float32)
                    + b_dec_ref[...])


def lstm_module_forward(x, embed, kparams):
    """x: (B, L, n_feat) (shape-only, like the PyTorch module); embed: (B, E)."""
    B, L, _ = x.shape
    E = embed.shape[1]
    H = kparams["w_hh_t"].shape[0]
    OP = kparams["w_dec_t"].shape[1]          # lane-padded output width
    O = kparams["output_size"]
    assert E == H, "module only works when embed_size == hidden_size"

    kernel = functools.partial(lstm_forward_kernel, hidden_size=H, length=L)
    vmem = pl.BlockSpec(memory_space=pltpu.MemorySpace.VMEM)   # whole array in VMEM

    # Gridless call: everything fits in VMEM, nothing to pipeline, no grid
    # scaffolding / per-step overhead.
    out_flat = pl.pallas_call(
        kernel,
        out_shape=jax.ShapeDtypeStruct((L * B, OP), jnp.float32),
        in_specs=[vmem] * 8,
        out_specs=vmem,
    )(embed, kparams["w_emb_t"], kparams["b_emb"],
      kparams["w_ih_t"], kparams["w_hh_t"], kparams["b_gates"],
      kparams["w_dec_t"], kparams["b_dec"])

    # rows are ordered (t, b) -> (L, B, O_pad); drop lane padding, batch-first.
    return jnp.transpose(out_flat.reshape(L, B, OP)[:, :, :O], (1, 0, 2))


def init_torch_params(key, embed_size, hidden_size, output_size):
    """Deterministic uniform init mirroring PyTorch's default Linear/LSTM init,
    stored in PyTorch layout / gate order (i, f, g, o)."""
    E, H, O = embed_size, hidden_size, output_size
    ks = jax.random.split(key, 8)

    def u(k, shape, bound):
        return jax.random.uniform(k, shape, jnp.float32, -bound, bound)

    k_emb = 1.0 / jnp.sqrt(E)
    k_lstm = 1.0 / jnp.sqrt(H)
    k_dec = 1.0 / jnp.sqrt(H)
    return {
        "w_emb": u(ks[0], (E, E), k_emb),      # Linear weight (out, in)
        "b_emb": u(ks[1], (E,), k_emb),
        "w_ih": u(ks[2], (4 * H, H), k_lstm),  # nn.LSTM weight_ih_l0, gates [i,f,g,o]
        "w_hh": u(ks[3], (4 * H, H), k_lstm),  # nn.LSTM weight_hh_l0
        "b_ih": u(ks[4], (4 * H,), k_lstm),
        "b_hh": u(ks[5], (4 * H,), k_lstm),
        "w_dec": u(ks[6], (O, H), k_dec),
        "b_dec": u(ks[7], (O,), k_dec),
    }


def prepare_kernel_params(tp, hidden_size, lane=128):
    """Transpose to (in, out), fuse the two LSTM biases, permute gate columns
    from PyTorch order [i, f, g, o] to kernel order [i, f, o, g], zero-pad the
    decoder to a lane-dense 128-column output, and pre-cast weight matrices
    (not biases) to bfloat16 for the MXU."""
    H = hidden_size
    O = tp["w_dec"].shape[0]
    OP = ((O + lane - 1) // lane) * lane
    idx = jnp.arange(H)
    perm = jnp.concatenate([idx, idx + H, idx + 3 * H, idx + 2 * H])  # i,f,o,g
    return {
        "w_emb_t": tp["w_emb"].T.astype(jnp.bfloat16),             # (E, E)
        "b_emb": tp["b_emb"][None, :],                             # (1, E) f32
        "w_ih_t": tp["w_ih"][perm, :].T.astype(jnp.bfloat16),      # (H, 4H) [i,f,o,g]
        "w_hh_t": tp["w_hh"][perm, :].T.astype(jnp.bfloat16),      # (H, 4H)
        "b_gates": (tp["b_ih"] + tp["b_hh"])[perm][None, :],       # (1, 4H) f32
        "w_dec_t": jnp.pad(tp["w_dec"].T,                          # (H, O_pad) bf16
                           ((0, 0), (0, OP - O))).astype(jnp.bfloat16),
        "b_dec": jnp.pad(tp["b_dec"], (0, OP - O))[None, :],       # (1, O_pad) f32
        "output_size": O,
    }


def _reference_forward(x, embed, tp):
    """Pure-JAX f32 mirror of the PyTorch forward (original layouts / gate order)."""
    B, L, _ = x.shape
    H = tp["w_hh"].shape[1]
    e = embed @ tp["w_emb"].T + tp["b_emb"]
    h = jnp.zeros((B, H), jnp.float32)
    c = jnp.zeros((B, H), jnp.float32)
    outs = []
    for _ in range(L):
        gates = (e @ tp["w_ih"].T + tp["b_ih"]
                 + h @ tp["w_hh"].T + tp["b_hh"])
        i = jax.nn.sigmoid(gates[:, 0 * H:1 * H])
        f = jax.nn.sigmoid(gates[:, 1 * H:2 * H])
        g = jnp.tanh(gates[:, 2 * H:3 * H])
        o = jax.nn.sigmoid(gates[:, 3 * H:4 * H])
        c = f * c + i * g
        h = o * jnp.tanh(c)
        outs.append(h @ tp["w_dec"].T + tp["b_dec"])
    return jnp.stack(outs, axis=1)   # (B, L, O)


if __name__ == "__main__":
    # Small shapes consistent with the module (embed_size must equal hidden_size).
    # B=8 fills a full sublane tile per the perf review (kernel is latency-bound).
    B, L, N_FEAT = 8, 8, 10
    EMBED_SIZE = HIDDEN_SIZE = 32
    OUTPUT_SIZE = 16

    key = jax.random.PRNGKey(0)
    k_param, k_x, k_e = jax.random.split(key, 3)

    torch_params = init_torch_params(k_param, EMBED_SIZE, HIDDEN_SIZE, OUTPUT_SIZE)
    kernel_params = prepare_kernel_params(torch_params, HIDDEN_SIZE)

    x = jax.random.normal(k_x, (B, L, N_FEAT), jnp.float32)     # shape-only input
    embed = jax.random.normal(k_e, (B, EMBED_SIZE), jnp.float32)

    out = lstm_module_forward(x, embed, kernel_params)
    out = jax.block_until_ready(out)
    assert out.shape == (B, L, OUTPUT_SIZE), out.shape

    ref = _reference_forward(x, embed, torch_params)
    # Tolerance loosened vs f32 reference because MXU operands are bf16.
    assert jnp.allclose(out, ref, atol=3e-2, rtol=3e-2), "mismatch vs JAX reference"

    print("KERNEL_OK")
</pallas_src>

<mosaic_0001>
module attributes {stable_mosaic.version = 11 : i64} {
  func.func @lstm_forward_kernel(%arg0: memref<8x32xf32, #tpu.memory_space<vmem>>, %arg1: memref<32x32xbf16, #tpu.memory_space<vmem>>, %arg2: memref<1x32xf32, #tpu.memory_space<vmem>>, %arg3: memref<32x128xbf16, #tpu.memory_space<vmem>>, %arg4: memref<32x128xbf16, #tpu.memory_space<vmem>>, %arg5: memref<1x128xf32, #tpu.memory_space<vmem>>, %arg6: memref<32x128xbf16, #tpu.memory_space<vmem>>, %arg7: memref<1x128xf32, #tpu.memory_space<vmem>>, %arg8: memref<64x128xf32, #tpu.memory_space<vmem>>) attributes {dimension_semantics = [], scalar_prefetch = 0 : i64, scratch_operands = 0 : i64, tpu.core_type = #tpu.core_type<tc>} {
    %c0 = arith.constant 0 : index
    %c0_0 = arith.constant 0 : index
    %0 = vector.load %arg0[%c0, %c0_0] : memref<8x32xf32, #tpu.memory_space<vmem>>, vector<8x32xf32>
    %1 = arith.truncf %0 : vector<8x32xf32> to vector<8x32xbf16>
    %c0_1 = arith.constant 0 : index
    %c0_2 = arith.constant 0 : index
    %2 = vector.load %arg1[%c0_1, %c0_2] : memref<32x32xbf16, #tpu.memory_space<vmem>>, vector<32x32xbf16>
    %cst = arith.constant dense<0.000000e+00> : vector<8x32xf32>
    %3 = tpu.matmul %1, %2, %cst {dimension_numbers = #tpu.dot_dimension_numbers<[1], [0], [0], [1], [0, 0, 1, 1], [], []>} : vector<8x32xbf16>, vector<32x32xbf16>, vector<8x32xf32> -> vector<8x32xf32>
    %c0_3 = arith.constant 0 : index
    %c0_4 = arith.constant 0 : index
    %4 = vector.load %arg2[%c0_3, %c0_4] : memref<1x32xf32, #tpu.memory_space<vmem>>, vector<1x32xf32>
    %5 = vector.broadcast %4 : vector<1x32xf32> to vector<8x32xf32>
    %6 = arith.addf %3, %5 : vector<8x32xf32>
    %7 = arith.truncf %6 : vector<8x32xf32> to vector<8x32xbf16>
    %c0_5 = arith.constant 0 : index
    %c0_6 = arith.constant 0 : index
    %8 = vector.load %arg3[%c0_5, %c0_6] : memref<32x128xbf16, #tpu.memory_space<vmem>>, vector<32x128xbf16>
    %cst_7 = arith.constant dense<0.000000e+00> : vector<8x128xf32>
    %9 = tpu.matmul %7, %8, %cst_7 {dimension_numbers = #tpu.dot_dimension_numbers<[1], [0], [0], [1], [0, 0, 1, 1], [], []>} : vector<8x32xbf16>, vector<32x128xbf16>, vector<8x128xf32> -> vector<8x128xf32>
    %c0_8 = arith.constant 0 : index
    %c0_9 = arith.constant 0 : index
    %10 = vector.load %arg5[%c0_8, %c0_9] : memref<1x128xf32, #tpu.memory_space<vmem>>, vector<1x128xf32>
    %11 = vector.broadcast %10 : vector<1x128xf32> to vector<8x128xf32>
    %12 = arith.addf %9, %11 : vector<8x128xf32>
    %c0_10 = arith.constant 0 : index
    %c0_11 = arith.constant 0 : index
    %13 = vector.load %arg4[%c0_10, %c0_11] : memref<32x128xbf16, #tpu.memory_space<vmem>>, vector<32x128xbf16>
    %cst_12 = arith.constant 0.000000e+00 : f32
    %14 = vector.broadcast %cst_12 : f32 to vector<8x32xf32>
    %cst_13 = arith.constant 0.000000e+00 : f32
    %15 = vector.broadcast %cst_13 : f32 to vector<8x32xf32>
    %16 = arith.truncf %14 : vector<8x32xf32> to vector<8x32xbf16>
    %cst_14 = arith.constant dense<0.000000e+00> : vector<8x128xf32>
    %17 = tpu.matmul %16, %13, %cst_14 {dimension_numbers = #tpu.dot_dimension_numbers<[1], [0], [0], [1], [0, 0, 1, 1], [], []>} : vector<8x32xbf16>, vector<32x128xbf16>, vector<8x128xf32> -> vector<8x128xf32>
    %18 = arith.addf %12, %17 : vector<8x128xf32>
    %19 = vector.extract_strided_slice %18 {offsets = [0, 0], sizes = [8, 96], strides = [1, 1]} : vector<8x128xf32> to vector<8x96xf32>
    %20 = arith.negf %19 : vector<8x96xf32>
    %21 = math.exp %20 : vector<8x96xf32>
    %cst_15 = arith.constant 1.000000e+00 : f32
    %22 = vector.broadcast %cst_15 : f32 to vector<8x96xf32>
    %23 = arith.addf %22, %21 : vector<8x96xf32>
    %24 = arith.divf %22, %23 : vector<8x96xf32>
    %25 = vector.extract_strided_slice %18 {offsets = [0, 96], sizes = [8, 32], strides = [1, 1]} : vector<8x128xf32> to vector<8x32xf32>
    %26 = math.tanh %25 : vector<8x32xf32>
    %27 = vector.extract_strided_slice %24 {offsets = [0, 0], sizes = [8, 32], strides = [1, 1]} : vector<8x96xf32> to vector<8x32xf32>
    %28 = vector.extract_strided_slice %24 {offsets = [0, 32], sizes = [8, 32], strides = [1, 1]} : vector<8x96xf32> to vector<8x32xf32>
    %29 = vector.extract_strided_slice %24 {offsets = [0, 64], sizes = [8, 32], strides = [1, 1]} : vector<8x96xf32> to vector<8x32xf32>
    %30 = arith.mulf %28, %15 : vector<8x32xf32>
    %31 = arith.mulf %27, %26 : vector<8x32xf32>
    %32 = arith.addf %30, %31 : vector<8x32xf32>
    %33 = math.tanh %32 : vector<8x32xf32>
    %34 = arith.mulf %29, %33 : vector<8x32xf32>
    %35 = arith.truncf %34 : vector<8x32xf32> to vector<8x32xbf16>
    %cst_16 = arith.constant dense<0.000000e+00> : vector<8x128xf32>
    %36 = tpu.matmul %35, %13, %cst_16 {dimension_numbers = #tpu.dot_dimension_numbers<[1], [0], [0], [1], [0, 0, 1, 1], [], []>} : vector<8x32xbf16>, vector<32x128xbf16>, vector<8x128xf32> -> vector<8x128xf32>
    %37 = arith.addf %12, %36 : vector<8x128xf32>
    %38 = vector.extract_strided_slice %37 {offsets = [0, 0], sizes = [8, 96], strides = [1, 1]} : vector<8x128xf32> to vector<8x96xf32>
    %39 = arith.negf %38 : vector<8x96xf32>
    %40 = math.exp %39 : vector<8x96xf32>
    %cst_17 = arith.constant 1.000000e+00 : f32
    %41 = vector.broadcast %cst_17 : f32 to vector<8x96xf32>
    %42 = arith.addf %41, %40 : vector<8x96xf32>
    %43 = arith.divf %41, %42 : vector<8x96xf32>
    %44 = vector.extract_strided_slice %37 {offsets = [0, 96], sizes = [8, 32], strides = [1, 1]} : vector<8x128xf32> to vector<8x32xf32>
    %45 = math.tanh %44 : vector<8x32xf32>
    %46 = vector.extract_strided_slice %43 {offsets = [0, 0], sizes = [8, 32], strides = [1, 1]} : vector<8x96xf32> to vector<8x32xf32>
    %47 = vector.extract_strided_slice %43 {offsets = [0, 32], sizes = [8, 32], strides = [1, 1]} : vector<8x96xf32> to vector<8x32xf32>
    %48 = vector.extract_strided_slice %43 {offsets = [0, 64], sizes = [8, 32], strides = [1, 1]} : vector<8x96xf32> to vector<8x32xf32>
    %49 = arith.mulf %47, %32 : vector<8x32xf32>
    %50 = arith.mulf %46, %45 : vector<8x32xf32>
    %51 = arith.addf %49, %50 : vector<8x32xf32>
    %52 = math.tanh %51 : vector<8x32xf32>
    %53 = arith.mulf %48, %52 : vector<8x32xf32>
    %54 = arith.truncf %53 : vector<8x32xf32> to vector<8x32xbf16>
    %cst_18 = arith.constant dense<0.000000e+00> : vector<8x128xf32>
    %55 = tpu.matmul %54, %13, %cst_18 {dimension_numbers = #tpu.dot_dimension_numbers<[1], [0], [0], [1], [0, 0, 1, 1], [], []>} : vector<8x32xbf16>, vector<32x128xbf16>, vector<8x128xf32> -> vector<8x128xf32>
    %56 = arith.addf %12, %55 : vector<8x128xf32>
    %57 = vector.extract_strided_slice %56 {offsets = [0, 0], sizes = [8, 96], strides = [1, 1]} : vector<8x128xf32> to vector<8x96xf32>
    %58 = arith.negf %57 : vector<8x96xf32>
    %59 = math.exp %58 : vector<8x96xf32>
    %cst_19 = arith.constant 1.000000e+00 : f32
    %60 = vector.broadcast %cst_19 : f32 to vector<8x96xf32>
    %61 = arith.addf %60, %59 : vector<8x96xf32>
    %62 = arith.divf %60, %61 : vector<8x96xf32>
    %63 = vector.extract_strided_slice %56 {offsets = [0, 96], sizes = [8, 32], strides = [1, 1]} : vector<8x128xf32> to vector<8x32xf32>
    %64 = math.tanh %63 : vector<8x32xf32>
    %65 = vector.extract_strided_slice %62 {offsets = [0, 0], sizes = [8, 32], strides = [1, 1]} : vector<8x96xf32> to vector<8x32xf32>
    %66 = vector.extract_strided_slice %62 {offsets = [0, 32], sizes = [8, 32], strides = [1, 1]} : vector<8x96xf32> to vector<8x32xf32>
    %67 = vector.extract_strided_slice %62 {offsets = [0, 64], sizes = [8, 32], strides = [1, 1]} : vector<8x96xf32> to vector<8x32xf32>
    %68 = arith.mulf %66, %51 : vector<8x32xf32>
    %69 = arith.mulf %65, %64 : vector<8x32xf32>
    %70 = arith.addf %68, %69 : vector<8x32xf32>
    %71 = math.tanh %70 : vector<8x32xf32>
    %72 = arith.mulf %67, %71 : vector<8x32xf32>
    %73 = arith.truncf %72 : vector<8x32xf32> to vector<8x32xbf16>
    %cst_20 = arith.constant dense<0.000000e+00> : vector<8x128xf32>
    %74 = tpu.matmul %73, %13, %cst_20 {dimension_numbers = #tpu.dot_dimension_numbers<[1], [0], [0], [1], [0, 0, 1, 1], [], []>} : vector<8x32xbf16>, vector<32x128xbf16>, vector<8x128xf32> -> vector<8x128xf32>
    %75 = arith.addf %12, %74 : vector<8x128xf32>
    %76 = vector.extract_strided_slice %75 {offsets = [0, 0], sizes = [8, 96], strides = [1, 1]} : vector<8x128xf32> to vector<8x96xf32>
    %77 = arith.negf %76 : vector<8x96xf32>
    %78 = math.exp %77 : vector<8x96xf32>
    %cst_21 = arith.constant 1.000000e+00 : f32
    %79 = vector.broadcast %cst_21 : f32 to vector<8x96xf32>
    %80 = arith.addf %79, %78 : vector<8x96xf32>
    %81 = arith.divf %79, %80 : vector<8x96xf32>
    %82 = vector.extract_strided_slice %75 {offsets = [0, 96], sizes = [8, 32], strides = [1, 1]} : vector<8x128xf32> to vector<8x32xf32>
    %83 = math.tanh %82 : vector<8x32xf32>
    %84 = vector.extract_strided_slice %81 {offsets = [0, 0], sizes = [8, 32], strides = [1, 1]} : vector<8x96xf32> to vector<8x32xf32>
    %85 = vector.extract_strided_slice %81 {offsets = [0, 32], sizes = [8, 32], strides = [1, 1]} : vector<8x96xf32> to vector<8x32xf32>
    %86 = vector.extract_strided_slice %81 {offsets = [0, 64], sizes = [8, 32], strides = [1, 1]} : vector<8x96xf32> to vector<8x32xf32>
    %87 = arith.mulf %85, %70 : vector<8x32xf32>
    %88 = arith.mulf %84, %83 : vector<8x32xf32>
    %89 = arith.addf %87, %88 : vector<8x32xf32>
    %90 = math.tanh %89 : vector<8x32xf32>
    %91 = arith.mulf %86, %90 : vector<8x32xf32>
    %92 = arith.truncf %91 : vector<8x32xf32> to vector<8x32xbf16>
    %cst_22 = arith.constant dense<0.000000e+00> : vector<8x128xf32>
    %93 = tpu.matmul %92, %13, %cst_22 {dimension_numbers = #tpu.dot_dimension_numbers<[1], [0], [0], [1], [0, 0, 1, 1], [], []>} : vector<8x32xbf16>, vector<32x128xbf16>, vector<8x128xf32> -> vector<8x128xf32>
    %94 = arith.addf %12, %93 : vector<8x128xf32>
    %95 = vector.extract_strided_slice %94 {offsets = [0, 0], sizes = [8, 96], strides = [1, 1]} : vector<8x128xf32> to vector<8x96xf32>
    %96 = arith.negf %95 : vector<8x96xf32>
    %97 = math.exp %96 : vector<8x96xf32>
    %cst_23 = arith.constant 1.000000e+00 : f32
    %98 = vector.broadcast %cst_23 : f32 to vector<8x96xf32>
    %99 = arith.addf %98, %97 : vector<8x96xf32>
    %100 = arith.divf %98, %99 : vector<8x96xf32>
    %101 = vector.extract_strided_slice %94 {offsets = [0, 96], sizes = [8, 32], strides = [1, 1]} : vector<8x128xf32> to vector<8x32xf32>
    %102 = math.tanh %101 : vector<8x32xf32>
    %103 = vector.extract_strided_slice %100 {offsets = [0, 0], sizes = [8, 32], strides = [1, 1]} : vector<8x96xf32> to vector<8x32xf32>
    %104 = vector.extract_strided_slice %100 {offsets = [0, 32], sizes = [8, 32], strides = [1, 1]} : vector<8x96xf32> to vector<8x32xf32>
    %105 = vector.extract_strided_slice %100 {offsets = [0, 64], sizes = [8, 32], strides = [1, 1]} : vector<8x96xf32> to vector<8x32xf32>
    %106 = arith.mulf %104, %89 : vector<8x32xf32>
    %107 = arith.mulf %103, %102 : vector<8x32xf32>
    %108 = arith.addf %106, %107 : vector<8x32xf32>
    %109 = math.tanh %108 : vector<8x32xf32>
    %110 = arith.mulf %105, %109 : vector<8x32xf32>
    %111 = arith.truncf %110 : vector<8x32xf32> to vector<8x32xbf16>
    %cst_24 = arith.constant dense<0.000000e+00> : vector<8x128xf32>
    %112 = tpu.matmul %111, %13, %cst_24 {dimension_numbers = #tpu.dot_dimension_numbers<[1], [0], [0], [1], [0, 0, 1, 1], [], []>} : vector<8x32xbf16>, vector<32x128xbf16>, vector<8x128xf32> -> vector<8x128xf32>
    %113 = arith.addf %12, %112 : vector<8x128xf32>
    %114 = vector.extract_strided_slice %113 {offsets = [0, 0], sizes = [8, 96], strides = [1, 1]} : vector<8x128xf32> to vector<8x96xf32>
    %115 = arith.negf %114 : vector<8x96xf32>
    %116 = math.exp %115 : vector<8x96xf32>
    %cst_25 = arith.constant 1.000000e+00 : f32
    %117 = vector.broadcast %cst_25 : f32 to vector<8x96xf32>
    %118 = arith.addf %117, %116 : vector<8x96xf32>
    %119 = arith.divf %117, %118 : vector<8x96xf32>
    %120 = vector.extract_strided_slice %113 {offsets = [0, 96], sizes = [8, 32], strides = [1, 1]} : vector<8x128xf32> to vector<8x32xf32>
    %121 = math.tanh %120 : vector<8x32xf32>
    %122 = vector.extract_strided_slice %119 {offsets = [0, 0], sizes = [8, 32], strides = [1, 1]} : vector<8x96xf32> to vector<8x32xf32>
    %123 = vector.extract_strided_slice %119 {offsets = [0, 32], sizes = [8, 32], strides = [1, 1]} : vector<8x96xf32> to vector<8x32xf32>
    %124 = vector.extract_strided_slice %119 {offsets = [0, 64], sizes = [8, 32], strides = [1, 1]} : vector<8x96xf32> to vector<8x32xf32>
    %125 = arith.mulf %123, %108 : vector<8x32xf32>
    %126 = arith.mulf %122, %121 : vector<8x32xf32>
    %127 = arith.addf %125, %126 : vector<8x32xf32>
    %128 = math.tanh %127 : vector<8x32xf32>
    %129 = arith.mulf %124, %128 : vector<8x32xf32>
    %130 = arith.truncf %129 : vector<8x32xf32> to vector<8x32xbf16>
    %cst_26 = arith.constant dense<0.000000e+00> : vector<8x128xf32>
    %131 = tpu.matmul %130, %13, %cst_26 {dimension_numbers = #tpu.dot_dimension_numbers<[1], [0], [0], [1], [0, 0, 1, 1], [], []>} : vector<8x32xbf16>, vector<32x128xbf16>, vector<8x128xf32> -> vector<8x128xf32>
    %132 = arith.addf %12, %131 : vector<8x128xf32>
    %133 = vector.extract_strided_slice %132 {offsets = [0, 0], sizes = [8, 96], strides = [1, 1]} : vector<8x128xf32> to vector<8x96xf32>
    %134 = arith.negf %133 : vector<8x96xf32>
    %135 = math.exp %134 : vector<8x96xf32>
    %cst_27 = arith.constant 1.000000e+00 : f32
    %136 = vector.broadcast %cst_27 : f32 to vector<8x96xf32>
    %137 = arith.addf %136, %135 : vector<8x96xf32>
    %138 = arith.divf %136, %137 : vector<8x96xf32>
    %139 = vector.extract_strided_slice %132 {offsets = [0, 96], sizes = [8, 32], strides = [1, 1]} : vector<8x128xf32> to vector<8x32xf32>
    %140 = math.tanh %139 : vector<8x32xf32>
    %141 = vector.extract_strided_slice %138 {offsets = [0, 0], sizes = [8, 32], strides = [1, 1]} : vector<8x96xf32> to vector<8x32xf32>
    %142 = vector.extract_strided_slice %138 {offsets = [0, 32], sizes = [8, 32], strides = [1, 1]} : vector<8x96xf32> to vector<8x32xf32>
    %143 = vector.extract_strided_slice %138 {offsets = [0, 64], sizes = [8, 32], strides = [1, 1]} : vector<8x96xf32> to vector<8x32xf32>
    %144 = arith.mulf %142, %127 : vector<8x32xf32>
    %145 = arith.mulf %141, %140 : vector<8x32xf32>
    %146 = arith.addf %144, %145 : vector<8x32xf32>
    %147 = math.tanh %146 : vector<8x32xf32>
    %148 = arith.mulf %143, %147 : vector<8x32xf32>
    %149 = arith.truncf %148 : vector<8x32xf32> to vector<8x32xbf16>
    %cst_28 = arith.constant dense<0.000000e+00> : vector<8x128xf32>
    %150 = tpu.matmul %149, %13, %cst_28 {dimension_numbers = #tpu.dot_dimension_numbers<[1], [0], [0], [1], [0, 0, 1, 1], [], []>} : vector<8x32xbf16>, vector<32x128xbf16>, vector<8x128xf32> -> vector<8x128xf32>
    %151 = arith.addf %12, %150 : vector<8x128xf32>
    %152 = vector.extract_strided_slice %151 {offsets = [0, 0], sizes = [8, 96], strides = [1, 1]} : vector<8x128xf32> to vector<8x96xf32>
    %153 = arith.negf %152 : vector<8x96xf32>
    %154 = math.exp %153 : vector<8x96xf32>
    %cst_29 = arith.constant 1.000000e+00 : f32
    %155 = vector.broadcast %cst_29 : f32 to vector<8x96xf32>
    %156 = arith.addf %155, %154 : vector<8x96xf32>
    %157 = arith.divf %155, %156 : vector<8x96xf32>
    %158 = vector.extract_strided_slice %151 {offsets = [0, 96], sizes = [8, 32], strides = [1, 1]} : vector<8x128xf32> to vector<8x32xf32>
    %159 = math.tanh %158 : vector<8x32xf32>
    %160 = vector.extract_strided_slice %157 {offsets = [0, 0], sizes = [8, 32], strides = [1, 1]} : vector<8x96xf32> to vector<8x32xf32>
    %161 = vector.extract_strided_slice %157 {offsets = [0, 32], sizes = [8, 32], strides = [1, 1]} : vector<8x96xf32> to vector<8x32xf32>
    %162 = vector.extract_strided_slice %157 {offsets = [0, 64], sizes = [8, 32], strides = [1, 1]} : vector<8x96xf32> to vector<8x32xf32>
    %163 = arith.mulf %161, %146 : vector<8x32xf32>
    %164 = arith.mulf %160, %159 : vector<8x32xf32>
    %165 = arith.addf %163, %164 : vector<8x32xf32>
    %166 = math.tanh %165 : vector<8x32xf32>
    %167 = arith.mulf %162, %166 : vector<8x32xf32>
    %168 = tpu.concatenate %34, %53, %72, %91, %110, %129, %148, %167 in 0 : vector<8x32xf32>, vector<8x32xf32>, vector<8x32xf32>, vector<8x32xf32>, vector<8x32xf32>, vector<8x32xf32>, vector<8x32xf32>, vector<8x32xf32> -> vector<64x32xf32>
    %169 = arith.truncf %168 : vector<64x32xf32> to vector<64x32xbf16>
    %c0_30 = arith.constant 0 : index
    %c0_31 = arith.constant 0 : index
    %170 = vector.load %arg6[%c0_30, %c0_31] : memref<32x128xbf16, #tpu.memory_space<vmem>>, vector<32x128xbf16>
    %cst_32 = arith.constant dense<0.000000e+00> : vector<64x128xf32>
    %171 = tpu.matmul %169, %170, %cst_32 {dimension_numbers = #tpu.dot_dimension_numbers<[1], [0], [0], [1], [0, 0, 1, 1], [], []>} : vector<64x32xbf16>, vector<32x128xbf16>, vector<64x128xf32> -> vector<64x128xf32>
    %c0_33 = arith.constant 0 : index
    %c0_34 = arith.constant 0 : index
    %172 = vector.load %arg7[%c0_33, %c0_34] : memref<1x128xf32, #tpu.memory_space<vmem>>, vector<1x128xf32>
    %173 = vector.broadcast %172 : vector<1x128xf32> to vector<64x128xf32>
    %174 = arith.addf %171, %173 : vector<64x128xf32>
    %c0_35 = arith.constant 0 : index
    %c0_36 = arith.constant 0 : index
    %175 = vector.load %arg8[%c0_35, %c0_36] : memref<64x128xf32, #tpu.memory_space<vmem>>, vector<64x128xf32>
    tpu.vector_store %arg8[%c0_35, %c0_36], %174 {strides = array<i32>} : memref<64x128xf32, #tpu.memory_space<vmem>>, vector<64x128xf32>,
    return
  }
}

</mosaic_0001>

<bundles_post_ra>
// kernel: tpu_custom_call.1
= control target key start
LH: loop header
LB: loop body
LE: loop exit
PB: predicated region body
PF: predicated region fallthrough
CT: control target
= control target key end

     0   :  { %13 = vsyncpa [#allocation3], 0  ;;  %s1599_s0 = inlined_call_operand.hbm [shape: f32[8,32], index: 0, kind: input, shape index: {}]   ;;  %s1600_s1 = inlined_call_operand.hbm [shape: bf16[32,32], index: 1, kind: input, shape index: {}]   ;;  %s1601_s2 = inlined_call_operand.vmem [shape: f32[1,32], index: 2, kind: input, shape index: {}]   ;;  %s1602_s3 = inlined_call_operand.hbm [shape: bf16[32,128], index: 3, kind: input, shape index: {}]   ;;  %s1603_s4 = inlined_call_operand.hbm [shape: bf16[32,128], index: 4, kind: input, shape index: {}]   ;;  %s1604_s5 = inlined_call_operand.vmem [shape: f32[1,128], index: 5, kind: input, shape index: {}]   ;;  %s1605_s6 = inlined_call_operand.vmem [shape: bf16[32,128], index: 6, kind: input, shape index: {}]   ;;  %s1606_s7 = inlined_call_operand.vmem [shape: f32[1,128], index: 7, kind: input, shape index: {}]   ;;  %s1607_s8 = inlined_call_operand.hbm [shape: f32[64,128], index: 8, kind: output, shape index: {}]  }
   0x1   :  { %14 = vsyncpa [#allocation6], 0 }
   0x2   :  { %15 = vsyncpa [#allocation9], 0 }
   0x3   :  { %16 = vsyncpa [#allocation4], 0  ;;  %s1314_s27 = smov [#allocation5]   ;;  %s1196_s9 = scalar_lea.hbm %s1600_s1, 256 }
   0x4   :  { %s32_s28 = sshll.u32 %s1314_s27, 4  ;;  %p1197_p0 = scmp.ne.s32.totalorder %s1600_s1, %s1196_s9  ;;  %s33_s28 = int_to_ptr.vmem [resolvable:$true] %s32_s28 }
   0x5   :  { %p1200_p1 = scmp.lt.u32.totalorder %s1196_s9, %s1600_s1 }
   0x7   :  { %p1202_p2 = pnand %p1200_p1, %p1197_p0 }
   0x9   :  { %1205 = shalt.err (!%p1202_p2)
}
   0xa   :  { %s1206_s14 = scalar_lea.vmem %s33_s28, 256  ;;  %p1211_p4 = scmp.lt.s32.totalorder %s33_s28, %s33_s28 }
   0xb   :  { %p1207_p3 = scmp.ne.s32.totalorder %s33_s28, %s1206_s14  ;;  %p1212_p5 = scmp.lt.s32.totalorder %s1206_s14, %s1206_s14 }
   0xd   :  { %p1213_p6 = por %p1212_p5, %p1211_p4 }
   0xf   :  { %p1214_p7 = pnand %p1213_p6, %p1207_p3 }
  0x11   :  { %1217 = shalt.err (!%p1214_p7)
}
  0x12   :  { %s1315_s15 = smov 64   ;;  %s1316_s16 = smov 4  }
  0x13   :  { %38 = dma.hbm_to_vmem [thread:$0]  %s1600_s1, 256, %s33_s28, [#allocation6], %s1315_s15, %s1315_s15, %s1316_s16  }
  0x14   :  { %s1317_s19 = smov [#allocation2]   ;;  %s1318_s21 = smov [#allocation7]  }
  0x15   :  { %s23_s20 = sshll.u32 %s1317_s19, 4  ;;  %s46_s22 = sshll.u32 %s1318_s21, 4  ;;  %s24_s20 = int_to_ptr.vmem [resolvable:$true] %s23_s20  ;;  %s47_s22 = int_to_ptr.vmem [resolvable:$true] %s46_s22 }
  0x16   :  { %s1218_s25 = scalar_lea.hbm %s1599_s0, 128 }
  0x17   :  { %p1219_p8 = scmp.ne.s32.totalorder %s1599_s0, %s1218_s25  ;;  %p1222_p9 = scmp.lt.u32.totalorder %s1218_s25, %s1599_s0 }
  0x19   :  { %p1224_p10 = pnand %p1222_p9, %p1219_p8 }
  0x1b   :  { %1227 = shalt.err (!%p1224_p10)
}
  0x1c   :  { %s1228_s1 = scalar_lea.vmem %s24_s20, 128  ;;  %p1233_p12 = scmp.lt.s32.totalorder %s24_s20, %s24_s20 }
  0x1d   :  { %p1229_p11 = scmp.ne.s32.totalorder %s24_s20, %s1228_s1  ;;  %p1234_p13 = scmp.lt.s32.totalorder %s1228_s1, %s1228_s1 }
  0x1f   :  { %p1235_p0 = por %p1234_p13, %p1233_p12 }
  0x21   :  { %p1236_p1 = pnand %p1235_p0, %p1229_p11 }
  0x23   :  { %1239 = shalt.err (!%p1236_p1)
}
  0x24   :  { %26 = dma.hbm_to_vmem [thread:$0]  %s1599_s0, 128, %s24_s20, [#allocation3]  }
  0x25   :  { %s1240_s12 = scalar_lea.hbm %s1602_s3, 256 }
  0x26   :  { %p1241_p2 = scmp.ne.s32.totalorder %s1602_s3, %s1240_s12  ;;  %p1244_p3 = scmp.lt.u32.totalorder %s1240_s12, %s1602_s3 }
  0x28   :  { %p1246_p4 = pnand %p1244_p3, %p1241_p2 }
  0x2a   :  { %1249 = shalt.err (!%p1246_p4)
}
  0x2b   :  { %s1250_s19 = scalar_lea.vmem %s47_s22, 256  ;;  %p1255_p6 = scmp.lt.s32.totalorder %s47_s22, %s47_s22 }
  0x2c   :  { %p1251_p5 = scmp.ne.s32.totalorder %s47_s22, %s1250_s19  ;;  %p1256_p7 = scmp.lt.s32.totalorder %s1250_s19, %s1250_s19 }
  0x2e   :  { %p1257_p8 = por %p1256_p7, %p1255_p6 }
  0x30   :  { %p1258_p9 = pnand %p1257_p8, %p1251_p5 }
  0x32   :  { %1261 = shalt.err (!%p1258_p9)
}
  0x33   :  { %52 = dma.hbm_to_vmem [thread:$0]  %s1602_s3, 256, %s47_s22, [#allocation6], %s1315_s15, %s1315_s15, %s1316_s16  }
  0x34   :  { %s1319_s21 = smov [#allocation8]   ;;  %s1262_s26 = scalar_lea.hbm %s1603_s4, 256 }
  0x35   :  { %s58_s23 = sshll.u32 %s1319_s21, 4  ;;  %p1263_p10 = scmp.ne.s32.totalorder %s1603_s4, %s1262_s26  ;;  %s59_s23 = int_to_ptr.vmem [resolvable:$true] %s58_s23 }
  0x36   :  { %p1266_p11 = scmp.lt.u32.totalorder %s1262_s26, %s1603_s4 }
  0x38   :  { %p1268_p12 = pnand %p1266_p11, %p1263_p10 }
  0x3a   :  { %1271 = shalt.err (!%p1268_p12)
}
  0x3b   :  { %s1272_s28 = scalar_lea.vmem %s59_s23, 256  ;;  %p1277_p0 = scmp.lt.s32.totalorder %s59_s23, %s59_s23 }
  0x3c   :  { %p1273_p13 = scmp.ne.s32.totalorder %s59_s23, %s1272_s28  ;;  %p1278_p1 = scmp.lt.s32.totalorder %s1272_s28, %s1272_s28 }
  0x3e   :  { %p1279_p2 = por %p1278_p1, %p1277_p0 }
  0x40   :  { %p1280_p3 = pnand %p1279_p2, %p1273_p13 }
  0x42   :  { %1283 = shalt.err (!%p1280_p3)
}
  0x43   :  { %64 = dma.hbm_to_vmem [thread:$0]  %s1603_s4, 256, %s59_s23, [#allocation9], %s1315_s15, %s1315_s15, %s1316_s16  }
  0x44   :  { %1306 = dma.done.wait [#allocation3], 128  }
  0x45   :  { %1307 = vsyncadd [#allocation3], 4294967168 }
  0x46   :  { %1308 = dma.done.wait [#allocation6], 512  }
  0x47   :  { %1309 = vsyncadd [#allocation6], 4294966784 }
  0x48   :  { %1310 = dma.done.wait [#allocation9], 256  }
  0x49   :  { %1311 = vsyncadd [#allocation9], 4294967040  ;;  %v1320_v0 = vmov 0.0   ;;  %vm1321_vm0 = vmmov 0   ;;  %v1124_v1 = vld [vmem:[#allocation5] sm:$0xff]   ;;  %v1125_v2 = vld [vmem:[#allocation5 + $0x8] sm:$0xff]  }
  0x4a   :  { %1019 = vmatprep.subr.bf16.mxu1 %v1320_v0  ;;  %1023 = vmatprep.mubr.msk.bf16.mxu1 %vm1321_vm0, %v1320_v0  ;;  %v84_v3 = vld [vmem:[#allocation2] sm:$0xff]  ;;  %vm109_vm1 = vcmask 261120   ;;  %v1126_v4 = vld [vmem:[#allocation7] sm:$0xff]   ;;  %v1436_v5 = vld [vmem:[#allocation8] sm:$0xff]   ;;  %v1322_v9 = vmov 0   ;;  %s1323_s10 = smov 32  }
  0x4b   :  { %1035 = vmatprep.subr.bf16.mxu0 %v1320_v0  ;;  %1039 = vmatprep.mubr.msk.bf16.mxu0 %vm1321_vm0, %v1320_v0  ;;  %v85_v6 = vpack.c.bf16 %v84_v3, %v84_v3  ;;  %v1445_v7 = vld [vmem:[#allocation8 + $0x8] sm:$0xff]   ;;  %v1128_v8 = vld [vmem:[#allocation7 + $0x8] sm:$0xff]  }
  0x4c   :  { %1020 = vmatpush3.bf16.msra.mxu1 %v1124_v1  ;;  %1036 = vmatpush3.bf16.msra.mxu0 %v1436_v5  ;;  %v951_v10 = vld [vmem:[%s1601_s2] ss:$0 sm:$0xff] }
  0x4d   :  { %1021 = vmatprep.subr.bf16.mxu1 %v1320_v0  ;;  %1037 = vmatprep.subr.bf16.mxu0 %v1320_v0  ;;  %v955_v21 = vld [vmem:[%s1604_s5] ss:$0 sm:$0xff] }
  0x50   :  { %1022 = vmatpush3.bf16.msra.mxu1 %v1125_v2  ;;  %1038 = vmatpush3.bf16.msra.mxu0 %v1445_v7 }
  0x51   :  { %1027 = vmatprep.subr.bf16.mxu1 %v1320_v0  ;;  %1051 = vmatprep.subr.bf16.mxu0 %v1320_v0 }
  0x53   :  { %1024 = vmatmul.mubr.msk.bf16.vlgmr.msra.gmra.mrb[0].mxu1 %vm109_vm1, %v85_v6  ;;  %1040 = vmatmul.mubr.bf16.vlgmr.msra.gmra.mrb[0].mxu0 %v1322_v9 }
  0x54   :  { %1028 = vmatpush3.bf16.msra.mxu1 %v1126_v4  ;;  %1031 = vmatprep.mubr.msk.bf16.mxu1 %vm1321_vm0, %v1320_v0 }
  0x55   :  { %1029 = vmatprep.subr.bf16.mxu1 %v1320_v0  ;;  %1052 = vmatpush3.bf16.msra.mxu0 %v1436_v5 }
  0x56   :  { %1055 = vmatprep.mubr.msk.bf16.mxu0 %vm1321_vm0, %v1320_v0  ;;  %1053 = vmatprep.subr.bf16.mxu0 %v1320_v0 }
  0x58   :  { %1030 = vmatpush3.bf16.msra.mxu1 %v1128_v8 }
  0x59   :  { %1043 = vmatprep.subr.bf16.mxu1 %v1320_v0  ;;  %1054 = vmatpush3.bf16.msra.mxu0 %v1445_v7 }
  0x5a   :  { %1067 = vmatprep.subr.bf16.mxu0 %v1320_v0 }
 0x126   :  { %v147_v11 = vpop.f32.mrb[0].mxu1  ;;  %v273_v17 = vpop.f32.mrb[0].mxu0 }
 0x127   :  { %v148_v12 = vadd.f32 %v951_v10, %v147_v11  ;;  %v1025_v13 = vpop.f32.mrb[1].mxu1  ;;  %v1041_v18 = vpop.f32.mrb[1].mxu0 }
 0x128   :  { %v150_v14 = vpop.f32.mrb[2].mxu1  ;;  %v276_v19 = vpop.f32.mrb[2].mxu0 }
 0x129   :  { %v153_v15 = vpack.c.bf16 %v148_v12, %v148_v12  ;;  %v1026_v16 = vpop.f32.mrb[3].mxu1  ;;  %v1042_v20 = vpop.f32.mrb[3].mxu0 }
 0x12b   :  { %1032 = vmatmul.mubr.msk.bf16.vlgmr.msra.gmra.mrb[4].mxu1 %vm109_vm1, %v153_v15 }
 0x12c   :  { %1044 = vmatpush3.bf16.msra.mxu1 %v1436_v5  ;;  %1047 = vmatprep.mubr.msk.bf16.mxu1 %vm1321_vm0, %v1320_v0 }
 0x12d   :  { %1045 = vmatprep.subr.bf16.mxu1 %v1320_v0 }
 0x130   :  { %1046 = vmatpush3.bf16.msra.mxu1 %v1445_v7 }
 0x131   :  { %1059 = vmatprep.subr.bf16.mxu1 %v1320_v0 }
 0x1fe   :  { %v214_v22 = vpop.f32.mrb[4].mxu1 }
 0x1ff   :  { %v1469_v23 = vadd.f32 %v955_v21, %v214_v22  ;;  %v1033_v24 = vpop.f32.mrb[5].mxu1 }
 0x200   :  { %v217_v25 = vpop.f32.mrb[6].mxu1 }
 0x201   :  { %v1034_v26 = vpop.f32.mrb[7].mxu1  ;;  %v279_v27 = vadd.f32 %v273_v17, %v1469_v23 }
 0x203   :  { %1132 = vtanh.f32 %v279_v27  ;;  %v961_v29 = vmul.f32 -1.442695, %v279_v27 }
 0x205   :  { %1134 = vpow2.f32 %v961_v29 }
 0x20d   :  { %v1133_v28 = vpop.eup %1132 }
 0x20e   :  { %289 = vrot.lane.b32.xlu0 %v1133_v28, %s1323_s10 }
 0x20f   :  { %v1135_v30 = vpop.eup %1134 }
 0x210   :  { %v283_v31 = vadd.f32 1.0, %v1135_v30 }
 0x212   :  { %1136 = vrcp.f32 %v283_v31 }
 0x21c   :  { %v1137_v32 = vpop.eup %1136 }
 0x21d   :  { %v287_v35 = vmul.f32 0.0, %v1137_v32 }
 0x280   :  { %v290_v33 = vpop.permute.xlu0 %289 }
 0x281   :  { %v292_v34 = vmul.f32 %v1137_v32, %v290_v33 }
 0x283   :  { %294 = vrot.lane.b32.xlu0 %v292_v34, %s1323_s10 }
 0x2f5   :  { %v295_v36 = vpop.permute.xlu0 %294 }
 0x2f6   :  { %v297_v37 = vadd.f32 %v295_v36, %v287_v35 }
 0x2f8   :  { %1138 = vtanh.f32 %v297_v37 }
 0x302   :  { %v1139_v38 = vpop.eup %1138 }
 0x303   :  { %300 = vrot.lane.b32.xlu1 %v1139_v38, %s1323_s10 }
 0x375   :  { %v301_v39 = vpop.permute.xlu1 %300 }
 0x376   :  { %v1475_v40 = vmul.f32 %v1137_v32, %v301_v39 }
 0x378   :  { %v304_v41 = vpack.c.bf16 %v1475_v40, %v1475_v40 }
 0x37a   :  { %306 = vrot.lane.b32.xlu1 %v304_v41, %s1315_s15 }
 0x3ec   :  { %v307_v42 = vpop.permute.xlu1 %306 }
 0x3ed   :  { %1048 = vmatmul.mubr.msk.bf16.vlgmr.msra.gmra.mrb[8].mxu1 %vm109_vm1, %v307_v42 }
 0x3ee   :  { %1060 = vmatpush3.bf16.msra.mxu1 %v1436_v5  ;;  %1063 = vmatprep.mubr.msk.bf16.mxu1 %vm1321_vm0, %v1320_v0 }
 0x3ef   :  { %1061 = vmatprep.subr.bf16.mxu1 %v1320_v0 }
 0x3f2   :  { %1062 = vmatpush3.bf16.msra.mxu1 %v1445_v7 }
 0x3f3   :  { %1075 = vmatprep.subr.bf16.mxu1 %v1320_v0 }
 0x4c0   :  { %v345_v43 = vpop.f32.mrb[8].mxu1 }
 0x4c1   :  { %v351_v44 = vadd.f32 %v345_v43, %v1469_v23  ;;  %v1049_v45 = vpop.f32.mrb[9].mxu1 }
 0x4c2   :  { %v348_v46 = vpop.f32.mrb[10].mxu1 }
 0x4c3   :  { %1140 = vtanh.f32 %v351_v44  ;;  %v1050_v47 = vpop.f32.mrb[11].mxu1  ;;  %v963_v49 = vmul.f32 -1.442695, %v351_v44 }
 0x4c5   :  { %1142 = vpow2.f32 %v963_v49 }
 0x4cd   :  { %v1141_v48 = vpop.eup %1140 }
 0x4ce   :  { %361 = vrot.lane.b32.xlu0 %v1141_v48, %s1323_s10 }
 0x4cf   :  { %v1143_v50 = vpop.eup %1142 }
 0x4d0   :  { %v355_v51 = vadd.f32 1.0, %v1143_v50 }
 0x4d2   :  { %1144 = vrcp.f32 %v355_v51 }
 0x4dc   :  { %v1145_v52 = vpop.eup %1144 }
 0x4dd   :  { %v359_v55 = vmul.f32 %v1145_v52, %v297_v37 }
 0x540   :  { %v362_v53 = vpop.permute.xlu0 %361 }
 0x541   :  { %v364_v54 = vmul.f32 %v1145_v52, %v362_v53 }
 0x543   :  { %366 = vrot.lane.b32.xlu1 %v364_v54, %s1323_s10 }
 0x5b5   :  { %v367_v56 = vpop.permute.xlu1 %366 }
 0x5b6   :  { %v369_v57 = vadd.f32 %v367_v56, %v359_v55 }
 0x5b8   :  { %1146 = vtanh.f32 %v369_v57 }
 0x5c2   :  { %v1147_v58 = vpop.eup %1146 }
 0x5c3   :  { %372 = vrot.lane.b32.xlu0 %v1147_v58, %s1323_s10 }
 0x635   :  { %v373_v59 = vpop.permute.xlu0 %372 }
 0x636   :  { %v1491_v60 = vmul.f32 %v1145_v52, %v373_v59 }
 0x638   :  { %v376_v61 = vpack.c.bf16 %v1491_v60, %v1491_v60 }
 0x63a   :  { %378 = vrot.lane.b32.xlu1 %v376_v61, %s1315_s15 }
 0x6ac   :  { %v379_v62 = vpop.permute.xlu1 %378 }
 0x6ad   :  { %1056 = vmatmul.mubr.msk.bf16.vlgmr.msra.gmra.mrb[4].mxu0 %vm109_vm1, %v379_v62 }
 0x6ae   :  { %1068 = vmatpush3.bf16.msra.mxu0 %v1436_v5  ;;  %1071 = vmatprep.mubr.msk.bf16.mxu0 %vm1321_vm0, %v1320_v0 }
 0x6af   :  { %1069 = vmatprep.subr.bf16.mxu0 %v1320_v0 }
 0x6b2   :  { %1070 = vmatpush3.bf16.msra.mxu0 %v1445_v7 }
 0x6b3   :  { %1083 = vmatprep.subr.bf16.mxu0 %v1320_v0 }
 0x780   :  { %v417_v63 = vpop.f32.mrb[4].mxu0 }
 0x781   :  { %v423_v1 = vadd.f32 %v417_v63, %v1469_v23  ;;  %v1057_v2 = vpop.f32.mrb[5].mxu0 }
 0x782   :  { %v420_v3 = vpop.f32.mrb[6].mxu0 }
 0x783   :  { %1148 = vtanh.f32 %v423_v1  ;;  %v1058_v4 = vpop.f32.mrb[7].mxu0  ;;  %v965_v8 = vmul.f32 -1.442695, %v423_v1 }
 0x785   :  { %1150 = vpow2.f32 %v965_v8 }
 0x78d   :  { %v1149_v6 = vpop.eup %1148 }
 0x78e   :  { %433 = vrot.lane.b32.xlu0 %v1149_v6, %s1323_s10 }
 0x78f   :  { %v1151_v9 = vpop.eup %1150 }
 0x790   :  { %v427_v10 = vadd.f32 1.0, %v1151_v9 }
 0x792   :  { %1152 = vrcp.f32 %v427_v10 }
 0x79c   :  { %v1153_v11 = vpop.eup %1152 }
 0x79d   :  { %v431_v14 = vmul.f32 %v1153_v11, %v369_v57 }
 0x800   :  { %v434_v12 = vpop.permute.xlu0 %433 }
 0x801   :  { %v436_v13 = vmul.f32 %v1153_v11, %v434_v12 }
 0x803   :  { %438 = vrot.lane.b32.xlu1 %v436_v13, %s1323_s10 }
 0x875   :  { %v439_v15 = vpop.permute.xlu1 %438 }
 0x876   :  { %v441_v16 = vadd.f32 %v439_v15, %v431_v14 }
 0x878   :  { %1154 = vtanh.f32 %v441_v16 }
 0x882   :  { %v1155_v17 = vpop.eup %1154 }
 0x883   :  { %444 = vrot.lane.b32.xlu0 %v1155_v17, %s1323_s10 }
 0x8f5   :  { %v445_v18 = vpop.permute.xlu0 %444 }
 0x8f6   :  { %v1507_v19 = vmul.f32 %v1153_v11, %v445_v18 }
 0x8f8   :  { %v448_v20 = vpack.c.bf16 %v1507_v19, %v1507_v19 }
 0x8fa   :  { %450 = vrot.lane.b32.xlu1 %v448_v20, %s1315_s15 }
 0x96c   :  { %v451_v21 = vpop.permute.xlu1 %450 }
 0x96d   :  { %1064 = vmatmul.mubr.msk.bf16.vlgmr.msra.gmra.mrb[12].mxu1 %vm109_vm1, %v451_v21 }
 0x96e   :  { %1076 = vmatpush3.bf16.msra.mxu1 %v1436_v5  ;;  %1079 = vmatprep.mubr.msk.bf16.mxu1 %vm1321_vm0, %v1320_v0 }
 0x96f   :  { %1077 = vmatprep.subr.bf16.mxu1 %v1320_v0 }
 0x972   :  { %1078 = vmatpush3.bf16.msra.mxu1 %v1445_v7 }
 0x973   :  { %1091 = vmatprep.subr.bf16.mxu1 %v1320_v0 }
 0xa40   :  { %v489_v22 = vpop.f32.mrb[12].mxu1 }
 0xa41   :  { %v495_v24 = vadd.f32 %v489_v22, %v1469_v23  ;;  %v1065_v25 = vpop.f32.mrb[13].mxu1 }
 0xa42   :  { %v492_v26 = vpop.f32.mrb[14].mxu1 }
 0xa43   :  { %1156 = vtanh.f32 %v495_v24  ;;  %v1066_v27 = vpop.f32.mrb[15].mxu1  ;;  %v967_v29 = vmul.f32 -1.442695, %v495_v24 }
 0xa45   :  { %1158 = vpow2.f32 %v967_v29 }
 0xa4d   :  { %v1157_v28 = vpop.eup %1156 }
 0xa4e   :  { %505 = vrot.lane.b32.xlu0 %v1157_v28, %s1323_s10 }
 0xa4f   :  { %v1159_v30 = vpop.eup %1158 }
 0xa50   :  { %v499_v31 = vadd.f32 1.0, %v1159_v30 }
 0xa52   :  { %1160 = vrcp.f32 %v499_v31 }
 0xa5c   :  { %v1161_v32 = vpop.eup %1160 }
 0xa5d   :  { %v503_v35 = vmul.f32 %v1161_v32, %v441_v16 }
 0xac0   :  { %v506_v33 = vpop.permute.xlu0 %505 }
 0xac1   :  { %v508_v34 = vmul.f32 %v1161_v32, %v506_v33 }
 0xac3   :  { %510 = vrot.lane.b32.xlu1 %v508_v34, %s1323_s10 }
 0xb35   :  { %v511_v36 = vpop.permute.xlu1 %510 }
 0xb36   :  { %v513_v37 = vadd.f32 %v511_v36, %v503_v35 }
 0xb38   :  { %1162 = vtanh.f32 %v513_v37 }
 0xb42   :  { %v1163_v38 = vpop.eup %1162 }
 0xb43   :  { %516 = vrot.lane.b32.xlu0 %v1163_v38, %s1323_s10 }
 0xbb5   :  { %v517_v39 = vpop.permute.xlu0 %516 }
 0xbb6   :  { %v1523_v41 = vmul.f32 %v1161_v32, %v517_v39 }
 0xbb8   :  { %v520_v42 = vpack.c.bf16 %v1523_v41, %v1523_v41 }
 0xbba   :  { %522 = vrot.lane.b32.xlu1 %v520_v42, %s1315_s15 }
 0xc2c   :  { %v523_v43 = vpop.permute.xlu1 %522 }
 0xc2d   :  { %1072 = vmatmul.mubr.msk.bf16.vlgmr.msra.gmra.mrb[8].mxu0 %vm109_vm1, %v523_v43 }
 0xc2e   :  { %1084 = vmatpush3.bf16.msra.mxu0 %v1436_v5  ;;  %1087 = vmatprep.mubr.msk.bf16.mxu0 %vm1321_vm0, %v1320_v0 }
 0xc2f   :  { %1085 = vmatprep.subr.bf16.mxu0 %v1320_v0 }
 0xc32   :  { %1086 = vmatpush3.bf16.msra.mxu0 %v1445_v7 }
 0xd00   :  { %v561_v44 = vpop.f32.mrb[8].mxu0 }
 0xd01   :  { %v567_v45 = vadd.f32 %v561_v44, %v1469_v23  ;;  %v1073_v46 = vpop.f32.mrb[9].mxu0 }
 0xd02   :  { %v564_v47 = vpop.f32.mrb[10].mxu0 }
 0xd03   :  { %1164 = vtanh.f32 %v567_v45  ;;  %v1074_v48 = vpop.f32.mrb[11].mxu0  ;;  %v969_v50 = vmul.f32 -1.442695, %v567_v45 }
 0xd05   :  { %1166 = vpow2.f32 %v969_v50 }
 0xd0d   :  { %v1165_v49 = vpop.eup %1164 }
 0xd0e   :  { %577 = vrot.lane.b32.xlu0 %v1165_v49, %s1323_s10 }
 0xd0f   :  { %v1167_v51 = vpop.eup %1166 }
 0xd10   :  { %v571_v52 = vadd.f32 1.0, %v1167_v51 }
 0xd12   :  { %1168 = vrcp.f32 %v571_v52 }
 0xd1c   :  { %v1169_v53 = vpop.eup %1168 }
 0xd1d   :  { %v575_v56 = vmul.f32 %v1169_v53, %v513_v37 }
 0xd80   :  { %v578_v54 = vpop.permute.xlu0 %577 }
 0xd81   :  { %v580_v55 = vmul.f32 %v1169_v53, %v578_v54 }
 0xd83   :  { %582 = vrot.lane.b32.xlu1 %v580_v55, %s1323_s10 }
 0xdf5   :  { %v583_v57 = vpop.permute.xlu1 %582 }
 0xdf6   :  { %v585_v58 = vadd.f32 %v583_v57, %v575_v56  ;;  %v1130_v57 = vld [vmem:[%s1605_s6] sm:$0xff]  }
 0xdf7   :  { %1099 = vmatprep.subr.bf16.mxu0 %v1130_v57 }
 0xdf8   :  { %1170 = vtanh.f32 %v585_v58 }
 0xe02   :  { %v1171_v59 = vpop.eup %1170 }
 0xe03   :  { %588 = vrot.lane.b32.xlu0 %v1171_v59, %s1323_s10 }
 0xe75   :  { %v589_v61 = vpop.permute.xlu0 %588 }
 0xe76   :  { %v1538_v62 = vmul.f32 %v1169_v53, %v589_v61  ;;  %v1131_v61 = vld [vmem:[%s1605_s6 + $0x8] sm:$0xff]  }
 0xe78   :  { %v592_v63 = vpack.c.bf16 %v1538_v62, %v1538_v62 }
 0xe7a   :  { %594 = vrot.lane.b32.xlu1 %v592_v63, %s1315_s15 }
 0xeec   :  { %v595_v1 = vpop.permute.xlu1 %594 }
 0xeed   :  { %1080 = vmatmul.mubr.msk.bf16.vlgmr.msra.gmra.mrb[16].mxu1 %vm109_vm1, %v595_v1 }
 0xeee   :  { %1092 = vmatpush3.bf16.msra.mxu1 %v1436_v5  ;;  %1095 = vmatprep.mubr.msk.bf16.mxu1 %vm1321_vm0, %v1320_v0 }
 0xeef   :  { %1093 = vmatprep.subr.bf16.mxu1 %v1320_v0 }
 0xef2   :  { %1094 = vmatpush3.bf16.msra.mxu1 %v1445_v7 }
 0xfc0   :  { %v633_v2 = vpop.f32.mrb[16].mxu1 }
 0xfc1   :  { %v639_v3 = vadd.f32 %v633_v2, %v1469_v23  ;;  %v1081_v4 = vpop.f32.mrb[17].mxu1 }
 0xfc2   :  { %v636_v6 = vpop.f32.mrb[18].mxu1 }
 0xfc3   :  { %1172 = vtanh.f32 %v639_v3  ;;  %v1082_v8 = vpop.f32.mrb[19].mxu1  ;;  %v971_v10 = vmul.f32 -1.442695, %v639_v3 }
 0xfc5   :  { %1174 = vpow2.f32 %v971_v10 }
 0xfcd   :  { %v1173_v9 = vpop.eup %1172 }
 0xfce   :  { %649 = vrot.lane.b32.xlu0 %v1173_v9, %s1323_s10 }
 0xfcf   :  { %v1175_v5 = vpop.eup %1174 }
 0xfd0   :  { %v643_v11 = vadd.f32 1.0, %v1175_v5 }
 0xfd2   :  { %1176 = vrcp.f32 %v643_v11 }
 0xfdc   :  { %v1177_v12 = vpop.eup %1176 }
 0xfdd   :  { %v647_v7 = vmul.f32 %v1177_v12, %v585_v58 }
0x1040   :  { %v650_v13 = vpop.permute.xlu0 %649 }
0x1041   :  { %v652_v0 = vmul.f32 %v1177_v12, %v650_v13 }
0x1043   :  { %654 = vrot.lane.b32.xlu1 %v652_v0, %s1323_s10 }
0x10b5   :  { %v655_v14 = vpop.permute.xlu1 %654 }
0x10b6   :  { %v657_v15 = vadd.f32 %v655_v14, %v647_v7 }
0x10b8   :  { %1178 = vtanh.f32 %v657_v15 }
0x10c2   :  { %v1179_v16 = vpop.eup %1178 }
0x10c3   :  { %660 = vrot.lane.b32.xlu0 %v1179_v16, %s1323_s10 }
0x1135   :  { %v661_v17 = vpop.permute.xlu0 %660 }
0x1136   :  { %v663_v18 = vmul.f32 %v1177_v12, %v661_v17 }
0x1138   :  { %v664_v20 = vpack.c.bf16 %v663_v18, %v663_v18  ;;  %v810_v58 = vpack.c.bf16 %v663_v18, %v1538_v62  ;;  %v809_v62 = vpack.c.bf16 %v1523_v41, %v1507_v19  ;;  %v976_v19 = vld [vmem:[%s1606_s7] ss:$0 sm:$0xff] }
0x113a   :  { %666 = vrot.lane.b32.xlu1 %v664_v20, %s1315_s15 }
0x11ac   :  { %v667_v21 = vpop.permute.xlu1 %666 }
0x11ad   :  { %1088 = vmatmul.mubr.msk.bf16.vlgmr.msra.gmra.mrb[12].mxu0 %vm109_vm1, %v667_v21 }
0x11ae   :  { %1100 = vmatpush3.bf16.msra.mxu0 %v1130_v57 }
0x11af   :  { %1101 = vmatprep.subr.bf16.mxu0 %v1131_v61 }
0x11b2   :  { %1102 = vmatpush3.bf16.msra.mxu0 %v1131_v61 }
0x1280   :  { %v705_v22 = vpop.f32.mrb[12].mxu0 }
0x1281   :  { %v711_v24 = vadd.f32 %v705_v22, %v1469_v23  ;;  %v1089_v25 = vpop.f32.mrb[13].mxu0 }
0x1282   :  { %v708_v26 = vpop.f32.mrb[14].mxu0 }
0x1283   :  { %1180 = vtanh.f32 %v711_v24  ;;  %v1090_v27 = vpop.f32.mrb[15].mxu0  ;;  %v973_v29 = vmul.f32 -1.442695, %v711_v24 }
0x1285   :  { %1182 = vpow2.f32 %v973_v29 }
0x128d   :  { %v1181_v28 = vpop.eup %1180 }
0x128e   :  { %721 = vrot.lane.b32.xlu0 %v1181_v28, %s1323_s10 }
0x128f   :  { %v1183_v30 = vpop.eup %1182 }
0x1290   :  { %v715_v31 = vadd.f32 1.0, %v1183_v30 }
0x1292   :  { %1184 = vrcp.f32 %v715_v31 }
0x129c   :  { %v1185_v32 = vpop.eup %1184 }
0x129d   :  { %v719_v35 = vmul.f32 %v1185_v32, %v657_v15 }
0x1300   :  { %v722_v33 = vpop.permute.xlu0 %721 }
0x1301   :  { %v724_v34 = vmul.f32 %v1185_v32, %v722_v33 }
0x1303   :  { %726 = vrot.lane.b32.xlu1 %v724_v34, %s1323_s10 }
0x1375   :  { %v727_v36 = vpop.permute.xlu1 %726 }
0x1376   :  { %v729_v37 = vadd.f32 %v727_v36, %v719_v35 }
0x1378   :  { %1186 = vtanh.f32 %v729_v37 }
0x1382   :  { %v1187_v38 = vpop.eup %1186 }
0x1383   :  { %732 = vrot.lane.b32.xlu0 %v1187_v38, %s1323_s10 }
0x13f5   :  { %v733_v39 = vpop.permute.xlu0 %732 }
0x13f6   :  { %v735_v42 = vmul.f32 %v1185_v32, %v733_v39 }
0x13f8   :  { %v736_v43 = vpack.c.bf16 %v735_v42, %v735_v42 }
0x13fa   :  { %738 = vrot.lane.b32.xlu1 %v736_v43, %s1315_s15 }
0x146c   :  { %v739_v44 = vpop.permute.xlu1 %738 }
0x146d   :  { %1096 = vmatmul.mubr.msk.bf16.vlgmr.msra.gmra.mrb[20].mxu1 %vm109_vm1, %v739_v44 }
0x1540   :  { %v777_v45 = vpop.f32.mrb[20].mxu1 }
0x1541   :  { %v783_v46 = vadd.f32 %v777_v45, %v1469_v23  ;;  %v1097_v47 = vpop.f32.mrb[21].mxu1  ;;  %v808_v23 = vpack.c.bf16 %v1491_v60, %v1475_v40 }
0x1542   :  { %v780_v48 = vpop.f32.mrb[22].mxu1 }
0x1543   :  { %1188 = vtanh.f32 %v783_v46  ;;  %v1098_v49 = vpop.f32.mrb[23].mxu1  ;;  %v975_v51 = vmul.f32 -1.442695, %v783_v46 }
0x1545   :  { %1190 = vpow2.f32 %v975_v51 }
0x154d   :  { %v1189_v50 = vpop.eup %1188 }
0x154e   :  { %793 = vrot.lane.b32.xlu0 %v1189_v50, %s1323_s10 }
0x154f   :  { %v1191_v52 = vpop.eup %1190 }
0x1550   :  { %v787_v53 = vadd.f32 1.0, %v1191_v52 }
0x1552   :  { %1192 = vrcp.f32 %v787_v53 }
0x155c   :  { %v1193_v54 = vpop.eup %1192 }
0x155d   :  { %v791_v59 = vmul.f32 %v1193_v54, %v729_v37 }
0x15c0   :  { %v794_v55 = vpop.permute.xlu0 %793 }
0x15c1   :  { %v796_v56 = vmul.f32 %v1193_v54, %v794_v55 }
0x15c3   :  { %798 = vrot.lane.b32.xlu1 %v796_v56, %s1323_s10 }
0x15c7   :  { %827 = vrot.lane.b32.xlu1 %v808_v23, %s1315_s15 }
0x15cb   :  { %831 = vrot.lane.b32.xlu1 %v810_v58, %s1315_s15 }
0x1635   :  { %v799_v63 = vpop.permute.xlu1 %798 }
0x1636   :  { %v801_v1 = vadd.f32 %v799_v63, %v791_v59 }
0x1638   :  { %1194 = vtanh.f32 %v801_v1 }
0x1639   :  { %v828_v40 = vpop.permute.xlu1 %827 }
0x163a   :  { %1103 = vmatprep.mubr.msk.bf16.mxu0 %vm109_vm1, %v828_v40 }
0x163d   :  { %v832_v8 = vpop.permute.xlu1 %831 }
0x1642   :  { %v1195_v60 = vpop.eup %1194 }
0x1643   :  { %804 = vrot.lane.b32.xlu0 %v1195_v60, %s1323_s10 }
0x1647   :  { %829 = vrot.lane.b32.xlu0 %v809_v62, %s1315_s15 }
0x16b5   :  { %v805_v2 = vpop.permute.xlu0 %804 }
0x16b6   :  { %v807_v3 = vmul.f32 %v1193_v54, %v805_v2 }
0x16b8   :  { %v811_v4 = vpack.c.bf16 %v807_v3, %v735_v42 }
0x16b9   :  { %v830_v6 = vpop.permute.xlu0 %829 }
0x16ba   :  { %833 = vrot.lane.b32.xlu0 %v811_v4, %s1315_s15  ;;  %1104 = vmatmul.mubr.msk.bf16.vlgmr.msra.gmra.mrb[16].mxu0 %vm109_vm1, %v830_v6  ;;  %s1324_s15 = smov [#allocation10]  }
0x16bb   :  { %1107 = vmatprep.mubr.msk.bf16.mxu0 %vm109_vm1, %v832_v8  ;;  %s937_s17 = sshll.u32 %s1324_s15, 4  ;;  %s938_s17 = int_to_ptr.vmem [resolvable:$true] %s937_s17 }
0x16bc   :  { %s1284_s7 = scalar_lea.vmem %s938_s17, 1024  ;;  %p1289_p5 = scmp.lt.s32.totalorder %s938_s17, %s938_s17 }
0x16bd   :  { %p1285_p4 = scmp.ne.s32.totalorder %s938_s17, %s1284_s7  ;;  %p1290_p6 = scmp.lt.s32.totalorder %s1284_s7, %s1284_s7 }
0x16bf   :  { %p1291_p7 = por %p1290_p6, %p1289_p5 }
0x16c1   :  { %p1292_p8 = pnand %p1291_p7, %p1285_p4 }
0x172c   :  { %v834_v9 = vpop.permute.xlu0 %833 }
0x172d   :  { %1108 = vmatmul.mubr.msk.bf16.gmra.mrb[20].mxu0 %vm109_vm1, %v834_v9 }
0x178d   :  { %v1105_v41 = vpop.f32.mrb[16].mxu0 }
0x178e   :  { %v902_v10 = vadd.f32 %v1105_v41, %v976_v19  ;;  %v893_v5 = vpop.f32.mrb[17].mxu0 }
0x178f   :  { %v894_v11 = vadd.f32 %v976_v19, %v893_v5  ;;  %v1106_v12 = vpop.f32.mrb[18].mxu0 }
0x1790   :  { %926 = vst [vmem:[#allocation10 + $0x10] sm:$0xff] %v902_v10  ;;  %v905_v13 = vadd.f32 %v1106_v12, %v976_v19  ;;  %v896_v0 = vpop.f32.mrb[19].mxu0 }
0x1791   :  { %924 = vst [vmem:[#allocation10] sm:$0xff] %v894_v11  ;;  %v897_v7 = vadd.f32 %v976_v19, %v896_v0 }
0x1792   :  { %927 = vst [vmem:[#allocation10 + $0x18] sm:$0xff] %v905_v13 }
0x1793   :  { %925 = vst [vmem:[#allocation10 + $0x8] sm:$0xff] %v897_v7 }
0x1800   :  { %v1109_v14 = vpop.f32.mrb[20].mxu0 }
0x1801   :  { %v918_v15 = vadd.f32 %v1109_v14, %v976_v19  ;;  %v909_v16 = vpop.f32.mrb[21].mxu0 }
0x1802   :  { %v910_v17 = vadd.f32 %v976_v19, %v909_v16  ;;  %v1110_v18 = vpop.f32.mrb[22].mxu0 }
0x1803   :  { %930 = vst [vmem:[#allocation10 + $0x30] sm:$0xff] %v918_v15  ;;  %v921_v20 = vadd.f32 %v1110_v18, %v976_v19  ;;  %v912_v21 = vpop.f32.mrb[23].mxu0 }
0x1804   :  { %928 = vst [vmem:[#allocation10 + $0x20] sm:$0xff] %v910_v17  ;;  %v913_v22 = vadd.f32 %v976_v19, %v912_v21 }
0x1805   :  { %931 = vst [vmem:[#allocation10 + $0x38] sm:$0xff] %v921_v20 }
0x1806   :  { %929 = vst [vmem:[#allocation10 + $0x28] sm:$0xff] %v913_v22 }
0x1807   :  { %1295 = shalt.err (!%p1292_p8)
}
0x1808   :  { %s1296_s0 = scalar_lea.hbm %s1607_s8, 1024 }
0x1809   :  { %p1297_p9 = scmp.ne.s32.totalorder %s1607_s8, %s1296_s0  ;;  %p1300_p10 = scmp.lt.u32.totalorder %s1296_s0, %s1607_s8 }
0x180b   :  { %p1302_p11 = pnand %p1300_p10, %p1297_p9 }
0x180d   :  { %1305 = shalt.err (!%p1302_p11)
}
0x180e   :  { %s1325_s25 = smov 128   ;;  %s1326_s26 = smov 8  }
0x180f   :  { %943 = dma.vmem_to_hbm [thread:$0]  %s938_s17, 1024, %s1607_s8, [#allocation4], %s1325_s25, %s1325_s25, %s1326_s26  }
0x1810   :  { %1312 = dma.done.wait [#allocation4], 1024  }
0x1811   :  { %1313 = vsyncadd [#allocation4], 4294966272 }
0x1812   :  { %947 = vsyncpa [#allocation3], 1 }
0x1813   :  { %948 = vsyncpa [#allocation6], 1 }
0x1814   :  { %949 = vsyncpa [#allocation9], 1 }
0x1815   :  { %950 = vsyncpa [#allocation4], 1 }

</bundles_post_ra>
